<compile_context>
chip_gen: v6e
topology: v6e:2x2x1
jax: 0.10.0
libtpu: 0.0.40
codegen_flags: <defaults>
</compile_context>

<pallas_src>
import functools

import jax
import jax.numpy as jnp
from jax.experimental import pallas as pl
from jax.experimental.pallas import tpu as pltpu


def _round_up(x, m):
    return ((x + m - 1) // m) * m


def _cdiv(a, b):
    return -(-a // b)


def _vmem_cap_bytes():
    """Generation-aware VMEM cap: ~80% of physical per-core VMEM
    (leaves headroom for compiler scratch / spill slots)."""
    try:
        phys = int(pltpu.get_tpu_info().vmem_capacity_bytes)
    except Exception:
        phys = 64 << 20  # conservative (v7x-sized) fallback
    return max(32 << 20, int(phys * 0.8))


def _choose_tiling(batch, max_tile):
    """Pick (tile_b, padded_batch) so the grid divides the padded batch evenly
    and, when possible, has >= 2 steps (so both v7x TensorCores get work)."""
    b8 = _round_up(max(batch, 8), 8)
    n_tiles = _cdiv(b8, max_tile)
    tile_b = _round_up(_cdiv(b8, n_tiles), 8)
    if n_tiles == 1 and tile_b >= 16:
        # Split a single tile in two: negligible per-step overhead, 2x on v7x.
        n_tiles = 2
        tile_b = _round_up(_cdiv(b8, 2), 8)
    return tile_b, tile_b * n_tiles


def _mlp_fused_kernel(*refs, n_layers, activation):
    """Fused multi-layer MLP kernel.

    refs = (x_ref, w0, b0, w1, b1, ..., wL, bL, o_ref)
    x_ref: (tile_b, D0) f32   wi: (Di, Di+1) bf16   bi: (1, Di+1) bf16
    o_ref: (tile_b, DL+1) f32
    Hidden layers get the activation; the final layer is a plain linear.
    """
    x_ref = refs[0]
    o_ref = refs[-1]
    layer_refs = refs[1:-1]

    h = x_ref[...]  # f32 activations
    for i in range(n_layers + 1):
        w = layer_refs[2 * i][...]       # resident bf16 weight
        b = layer_refs[2 * i + 1][...]   # resident bf16 bias
        # MXU matmul: bf16 operands, f32 accumulator.
        h = jnp.dot(h.astype(w.dtype), w, preferred_element_type=jnp.float32)
        h = h + b.astype(jnp.float32)    # bias add + activation in f32 (VPU/EUP)
        if i < n_layers:
            if activation == "relu":
                h = jnp.maximum(h, 0.0)
            elif activation == "tanh":
                h = jnp.tanh(h)
            elif activation == "sigmoid":
                h = jax.nn.sigmoid(h)
            else:
                raise ValueError(f"unsupported activation: {activation!r}")
    o_ref[...] = h.astype(o_ref.dtype)


def _mlp_pallas_call(x_pad, params_pad, *, activation, tile_b, single_buffer_weights):
    """Single fused pallas_call over the whole (padded) MLP."""
    B_pad, Din_pad = x_pad.shape
    Dout_pad = params_pad[-1][0].shape[1]
    n_layers = len(params_pad) - 1
    grid = (B_pad // tile_b,)

    if single_buffer_weights:
        # Constant index_map -> fetched once; Buffered(1) halves VMEM residency.
        def w_spec(shape):
            return pl.BlockSpec(shape, lambda i: (0, 0),
                                pipeline_mode=pl.Buffered(1))
    else:
        def w_spec(shape):
            return pl.BlockSpec(shape, lambda i: (0, 0))

    in_specs = [pl.BlockSpec((tile_b, Din_pad), lambda i: (i, 0))]
    flat_params = []
    for (w, b) in params_pad:
        in_specs.append(w_spec(w.shape))
        in_specs.append(w_spec(b.shape))
        flat_params += [w, b]

    # VMEM budget: resident weights (x1 if single-buffered, else x2),
    # double-buffered x/o tiles, in-flight f32 intermediates, plus slack.
    weight_factor = 1 if single_buffer_weights else 2
    dmax = max([Din_pad, Dout_pad] + [w.shape[1] for (w, _) in params_pad])
    weight_bytes = sum(w.size * w.dtype.itemsize + b.size * b.dtype.itemsize
                       for (w, b) in params_pad)
    io_bytes = 2 * tile_b * (Din_pad + Dout_pad) * 4
    act_bytes = 2 * tile_b * dmax * 4
    vmem_limit = min(
        _vmem_cap_bytes(),
        max(32 << 20,
            weight_factor * weight_bytes + io_bytes + act_bytes + (2 << 20)))
    # TODO(synk): when resident weight bytes approach the VMEM cap, stream
    # weights per layer (pltpu.emit_pipeline / K-tiled grid axis) instead of
    # keeping everything resident.

    kernel = functools.partial(_mlp_fused_kernel,
                               n_layers=n_layers, activation=activation)
    return pl.pallas_call(
        kernel,
        out_shape=jax.ShapeDtypeStruct((B_pad, Dout_pad), jnp.float32),
        grid=grid,
        in_specs=in_specs,
        out_specs=pl.BlockSpec((tile_b, Dout_pad), lambda i: (i, 0)),
        compiler_params=pltpu.CompilerParams(
            dimension_semantics=("parallel",),
            vmem_limit_bytes=int(vmem_limit),
        ),
    )(x_pad, *flat_params)


@functools.partial(jax.jit, static_argnames=("activation", "tile_b", "b_pad",
                                             "n_out", "single_buffer_weights"))
def _mlp_forward(x, params_pad, *, activation, tile_b, b_pad, n_out,
                 single_buffer_weights):
    B, Din = x.shape
    Din_pad = params_pad[0][0].shape[0]
    if B == b_pad and Din == Din_pad:
        # Fast path: input is already tile-aligned and lane-dense; skip the
        # wrapper-side pad copy (a full extra HBM read+write otherwise).
        x_pad = x
    else:
        # Zero-pad batch + feature dims; zeros are exact no-ops for real lanes.
        x_pad = jnp.zeros((b_pad, Din_pad), jnp.float32).at[:B, :Din].set(x)
    out_pad = _mlp_pallas_call(x_pad, params_pad, activation=activation,
                               tile_b=tile_b,
                               single_buffer_weights=single_buffer_weights)
    return out_pad[:B, :n_out]


class MLPPallas:
    """Pallas re-implementation of the PyTorch MLP module.

    net_structure = [inputs, *hidden_layers, outputs]
    forward: act(linear) for every hidden layer, plain linear for the last.
    Weights are stored as (in_features, out_features) so y = x @ W + b, i.e.
    W = W_pytorch.T (numerically identical to nn.Linear up to param dtype).
    """

    LANE = 128      # TODO(synk): pad to 256 on v6e/v7x for >128-wide MXU-bound layers.
    MAX_TILE_B = 256

    def __init__(self, inputs=1, outputs=1, hidden_layers=(100,),
                 activation="relu", key=None, param_dtype=jnp.bfloat16):
        assert activation in ("relu", "tanh", "sigmoid"), \
            'Use "relu","tanh" or "sigmoid" as activation.'
        self.activation = activation
        self.inputs = inputs
        self.outputs = outputs
        self.net_structure = [inputs, *hidden_layers, outputs]
        self.nLayers = len(hidden_layers)
        self.param_dtype = param_dtype
        self._single_buffer = None   # resolved (with fallback) on first call
        if key is None:
            key = jax.random.PRNGKey(0)

        self.params = []       # unpadded f32 (reference / inspection)
        self.params_pad = []   # zero-padded, param_dtype (kernel input)
        dims_pad = [_round_up(d, self.LANE) for d in self.net_structure]
        for i in range(self.nLayers + 1):
            fan_in, fan_out = self.net_structure[i], self.net_structure[i + 1]
            key, wk, bk = jax.random.split(key, 3)
            # Deterministic init mimicking nn.Linear's U(-1/sqrt(fan_in), +..)
            bound = 1.0 / jnp.sqrt(jnp.float32(fan_in))
            w = jax.random.uniform(wk, (fan_in, fan_out), jnp.float32,
                                   minval=-bound, maxval=bound)
            b = jax.random.uniform(bk, (fan_out,), jnp.float32,
                                   minval=-bound, maxval=bound)
            self.params.append((w, b))

            w_pad = jnp.zeros((dims_pad[i], dims_pad[i + 1]), param_dtype)
            w_pad = w_pad.at[:fan_in, :fan_out].set(w.astype(param_dtype))
            b_pad = jnp.zeros((1, dims_pad[i + 1]), param_dtype)
            b_pad = b_pad.at[0, :fan_out].set(b.astype(param_dtype))
            self.params_pad.append((w_pad, b_pad))

    def __call__(self, x):
        x = jnp.asarray(x, jnp.float32)
        B = x.shape[0]
        tile_b, b_pad = _choose_tiling(B, self.MAX_TILE_B)
        kwargs = dict(activation=self.activation, tile_b=tile_b, b_pad=b_pad,
                      n_out=self.outputs)
        if self._single_buffer is None:
            try:
                out = _mlp_forward(x, tuple(self.params_pad),
                                   single_buffer_weights=True, **kwargs)
                out = jax.block_until_ready(out)
                self._single_buffer = True
                return out
            except Exception:
                # Fall back to default (double-buffered) weight pipelining.
                self._single_buffer = False
        return _mlp_forward(x, tuple(self.params_pad),
                            single_buffer_weights=self._single_buffer, **kwargs)


def _reference_forward(mlp, x):
    """Pure-JAX reference matching the kernel's numerics (bf16 dot operands,
    f32 accumulation, f32 bias/activation)."""
    h = jnp.asarray(x, jnp.float32)
    for i in range(mlp.nLayers + 1):
        w, b = mlp.params[i]
        wq = w.astype(mlp.param_dtype)
        bq = b.astype(mlp.param_dtype).astype(jnp.float32)
        h = jnp.dot(h.astype(mlp.param_dtype), wq,
                    preferred_element_type=jnp.float32) + bq
        if i < mlp.nLayers:
            if mlp.activation == "relu":
                h = jnp.maximum(h, 0.0)
            elif mlp.activation == "tanh":
                h = jnp.tanh(h)
            else:
                h = jax.nn.sigmoid(h)
    return h


if __name__ == "__main__":
    key = jax.random.PRNGKey(0)
    key, xkey, pkey, x2key, p2key = jax.random.split(key, 5)

    # Small regression-style MLP: 4 inputs -> [32, 32] hidden -> 1 output.
    batch, n_in, n_out = 8, 4, 1
    hidden = [32, 32]

    x = jax.random.normal(xkey, (batch, n_in), dtype=jnp.float32)
    mlp = MLPPallas(inputs=n_in, outputs=n_out, hidden_layers=hidden,
                    activation="relu", key=pkey)
    out = jax.block_until_ready(mlp(x))
    ref = jax.block_until_ready(_reference_forward(mlp, x))
    assert out.shape == (batch, n_out), out.shape
    assert jnp.allclose(out, ref, atol=5e-3, rtol=5e-3), "relu mismatch vs ref"

    # Second config exercises even batch tiling (300 rows -> 2 tiles of 152,
    # no 512-row over-padding) and a different activation.
    x2 = jax.random.normal(x2key, (300, 6), dtype=jnp.float32)
    mlp2 = MLPPallas(inputs=6, outputs=3, hidden_layers=[64],
                     activation="tanh", key=p2key)
    out2 = jax.block_until_ready(mlp2(x2))
    ref2 = jax.block_until_ready(_reference_forward(mlp2, x2))
    assert out2.shape == (300, 3), out2.shape
    assert jnp.allclose(out2, ref2, atol=5e-3, rtol=5e-3), "tanh mismatch vs ref"

    print("KERNEL_OK")
</pallas_src>

<mosaic_0001>
module attributes {stable_mosaic.version = 11 : i64} {
  func.func @_mlp_fused_kernel(%arg0: i32, %arg1: memref<8x128xf32, #tpu.memory_space<vmem>>, %arg2: memref<128x128xbf16, #tpu.memory_space<vmem>>, %arg3: memref<1x128xbf16, #tpu.memory_space<vmem>>, %arg4: memref<128x128xbf16, #tpu.memory_space<vmem>>, %arg5: memref<1x128xbf16, #tpu.memory_space<vmem>>, %arg6: memref<128x128xbf16, #tpu.memory_space<vmem>>, %arg7: memref<1x128xbf16, #tpu.memory_space<vmem>>, %arg8: memref<8x128xf32, #tpu.memory_space<vmem>>) attributes {dimension_semantics = [#tpu.dimension_semantics<parallel>], iteration_bounds = array<i64: 1>, scalar_prefetch = 0 : i64, scratch_operands = 0 : i64, tpu.core_type = #tpu.core_type<tc>, window_params = [{transform_indices = @transform_0, window_bounds = array<i64: 8, 128>}, {pipeline_mode = #tpu.pipeline_mode<synchronous>, transform_indices = @transform_1, window_bounds = array<i64: 128, 128>}, {pipeline_mode = #tpu.pipeline_mode<synchronous>, transform_indices = @transform_2, window_bounds = array<i64: 1, 128>}, {pipeline_mode = #tpu.pipeline_mode<synchronous>, transform_indices = @transform_3, window_bounds = array<i64: 128, 128>}, {pipeline_mode = #tpu.pipeline_mode<synchronous>, transform_indices = @transform_4, window_bounds = array<i64: 1, 128>}, {pipeline_mode = #tpu.pipeline_mode<synchronous>, transform_indices = @transform_5, window_bounds = array<i64: 128, 128>}, {pipeline_mode = #tpu.pipeline_mode<synchronous>, transform_indices = @transform_6, window_bounds = array<i64: 1, 128>}, {transform_indices = @transform_7, window_bounds = array<i64: 8, 128>}]} {
    %c0 = arith.constant 0 : index
    %c0_0 = arith.constant 0 : index
    %0 = vector.load %arg1[%c0, %c0_0] : memref<8x128xf32, #tpu.memory_space<vmem>>, vector<8x128xf32>
    %c0_1 = arith.constant 0 : index
    %c0_2 = arith.constant 0 : index
    %1 = vector.load %arg2[%c0_1, %c0_2] : memref<128x128xbf16, #tpu.memory_space<vmem>>, vector<128x128xbf16>
    %c0_3 = arith.constant 0 : index
    %c0_4 = arith.constant 0 : index
    %2 = vector.load %arg3[%c0_3, %c0_4] : memref<1x128xbf16, #tpu.memory_space<vmem>>, vector<1x128xbf16>
    %3 = arith.truncf %0 : vector<8x128xf32> to vector<8x128xbf16>
    %cst = arith.constant dense<0.000000e+00> : vector<8x128xf32>
    %4 = tpu.matmul %3, %1, %cst {dimension_numbers = #tpu.dot_dimension_numbers<[1], [0], [0], [1], [0, 0, 1, 1], [], []>} : vector<8x128xbf16>, vector<128x128xbf16>, vector<8x128xf32> -> vector<8x128xf32>
    %5 = arith.extf %2 : vector<1x128xbf16> to vector<1x128xf32>
    %6 = vector.broadcast %5 : vector<1x128xf32> to vector<8x128xf32>
    %7 = arith.addf %4, %6 : vector<8x128xf32>
    %cst_5 = arith.constant 0.000000e+00 : f32
    %8 = vector.broadcast %cst_5 : f32 to vector<8x128xf32>
    %9 = arith.maximumf %7, %8 : vector<8x128xf32>
    %c0_6 = arith.constant 0 : index
    %c0_7 = arith.constant 0 : index
    %10 = vector.load %arg4[%c0_6, %c0_7] : memref<128x128xbf16, #tpu.memory_space<vmem>>, vector<128x128xbf16>
    %c0_8 = arith.constant 0 : index
    %c0_9 = arith.constant 0 : index
    %11 = vector.load %arg5[%c0_8, %c0_9] : memref<1x128xbf16, #tpu.memory_space<vmem>>, vector<1x128xbf16>
    %12 = arith.truncf %9 : vector<8x128xf32> to vector<8x128xbf16>
    %cst_10 = arith.constant dense<0.000000e+00> : vector<8x128xf32>
    %13 = tpu.matmul %12, %10, %cst_10 {dimension_numbers = #tpu.dot_dimension_numbers<[1], [0], [0], [1], [0, 0, 1, 1], [], []>} : vector<8x128xbf16>, vector<128x128xbf16>, vector<8x128xf32> -> vector<8x128xf32>
    %14 = arith.extf %11 : vector<1x128xbf16> to vector<1x128xf32>
    %15 = vector.broadcast %14 : vector<1x128xf32> to vector<8x128xf32>
    %16 = arith.addf %13, %15 : vector<8x128xf32>
    %cst_11 = arith.constant 0.000000e+00 : f32
    %17 = vector.broadcast %cst_11 : f32 to vector<8x128xf32>
    %18 = arith.maximumf %16, %17 : vector<8x128xf32>
    %c0_12 = arith.constant 0 : index
    %c0_13 = arith.constant 0 : index
    %19 = vector.load %arg6[%c0_12, %c0_13] : memref<128x128xbf16, #tpu.memory_space<vmem>>, vector<128x128xbf16>
    %c0_14 = arith.constant 0 : index
    %c0_15 = arith.constant 0 : index
    %20 = vector.load %arg7[%c0_14, %c0_15] : memref<1x128xbf16, #tpu.memory_space<vmem>>, vector<1x128xbf16>
    %21 = arith.truncf %18 : vector<8x128xf32> to vector<8x128xbf16>
    %cst_16 = arith.constant dense<0.000000e+00> : vector<8x128xf32>
    %22 = tpu.matmul %21, %19, %cst_16 {dimension_numbers = #tpu.dot_dimension_numbers<[1], [0], [0], [1], [0, 0, 1, 1], [], []>} : vector<8x128xbf16>, vector<128x128xbf16>, vector<8x128xf32> -> vector<8x128xf32>
    %23 = arith.extf %20 : vector<1x128xbf16> to vector<1x128xf32>
    %24 = vector.broadcast %23 : vector<1x128xf32> to vector<8x128xf32>
    %25 = arith.addf %22, %24 : vector<8x128xf32>
    %c0_17 = arith.constant 0 : index
    %c0_18 = arith.constant 0 : index
    %26 = vector.load %arg8[%c0_17, %c0_18] : memref<8x128xf32, #tpu.memory_space<vmem>>, vector<8x128xf32>
    tpu.vector_store %arg8[%c0_17, %c0_18], %25 {strides = array<i32>} : memref<8x128xf32, #tpu.memory_space<vmem>>, vector<8x128xf32>,
    return
  }
  func.func @transform_0(%arg0: i32) -> (i32, i32) {
    %c0_i32 = arith.constant 0 : i32
    %c0_i32_0 = arith.constant 0 : i32
    return %arg0, %c0_i32 : i32, i32
  }
  func.func @transform_1(%arg0: i32) -> (i32, i32) {
    %c0_i32 = arith.constant 0 : i32
    %c0_i32_0 = arith.constant 0 : i32
    %c0_i32_1 = arith.constant 0 : i32
    return %c0_i32, %c0_i32_0 : i32, i32
  }
  func.func @transform_2(%arg0: i32) -> (i32, i32) {
    %c0_i32 = arith.constant 0 : i32
    %c0_i32_0 = arith.constant 0 : i32
    %c0_i32_1 = arith.constant 0 : i32
    return %c0_i32, %c0_i32_0 : i32, i32
  }
  func.func @transform_3(%arg0: i32) -> (i32, i32) {
    %c0_i32 = arith.constant 0 : i32
    %c0_i32_0 = arith.constant 0 : i32
    %c0_i32_1 = arith.constant 0 : i32
    return %c0_i32, %c0_i32_0 : i32, i32
  }
  func.func @transform_4(%arg0: i32) -> (i32, i32) {
    %c0_i32 = arith.constant 0 : i32
    %c0_i32_0 = arith.constant 0 : i32
    %c0_i32_1 = arith.constant 0 : i32
    return %c0_i32, %c0_i32_0 : i32, i32
  }
  func.func @transform_5(%arg0: i32) -> (i32, i32) {
    %c0_i32 = arith.constant 0 : i32
    %c0_i32_0 = arith.constant 0 : i32
    %c0_i32_1 = arith.constant 0 : i32
    return %c0_i32, %c0_i32_0 : i32, i32
  }
  func.func @transform_6(%arg0: i32) -> (i32, i32) {
    %c0_i32 = arith.constant 0 : i32
    %c0_i32_0 = arith.constant 0 : i32
    %c0_i32_1 = arith.constant 0 : i32
    return %c0_i32, %c0_i32_0 : i32, i32
  }
  func.func @transform_7(%arg0: i32) -> (i32, i32) {
    %c0_i32 = arith.constant 0 : i32
    %c0_i32_0 = arith.constant 0 : i32
    return %arg0, %c0_i32 : i32, i32
  }
}

module attributes {stable_mosaic.version = 11 : i64} {
  func.func @_mlp_fused_kernel(%arg0: i32, %arg1: memref<8x128xf32, #tpu.memory_space<vmem>>, %arg2: memref<128x128xbf16, #tpu.memory_space<vmem>>, %arg3: memref<1x128xbf16, #tpu.memory_space<vmem>>, %arg4: memref<128x128xbf16, #tpu.memory_space<vmem>>, %arg5: memref<1x128xbf16, #tpu.memory_space<vmem>>, %arg6: memref<128x128xbf16, #tpu.memory_space<vmem>>, %arg7: memref<1x128xbf16, #tpu.memory_space<vmem>>, %arg8: memref<8x128xf32, #tpu.memory_space<vmem>>) attributes {dimension_semantics = [#tpu.dimension_semantics<parallel>], iteration_bounds = array<i64: 1>, scalar_prefetch = 0 : i64, scratch_operands = 0 : i64, tpu.core_type = #tpu.core_type<tc>, window_params = [{transform_indices = @transform_0, window_bounds = array<i64: 8, 128>}, {pipeline_mode = #tpu.pipeline_mode<synchronous>, transform_indices = @transform_1, window_bounds = array<i64: 128, 128>}, {pipeline_mode = #tpu.pipeline_mode<synchronous>, transform_indices = @transform_2, window_bounds = array<i64: 1, 128>}, {pipeline_mode = #tpu.pipeline_mode<synchronous>, transform_indices = @transform_3, window_bounds = array<i64: 128, 128>}, {pipeline_mode = #tpu.pipeline_mode<synchronous>, transform_indices = @transform_4, window_bounds = array<i64: 1, 128>}, {pipeline_mode = #tpu.pipeline_mode<synchronous>, transform_indices = @transform_5, window_bounds = array<i64: 128, 128>}, {pipeline_mode = #tpu.pipeline_mode<synchronous>, transform_indices = @transform_6, window_bounds = array<i64: 1, 128>}, {transform_indices = @transform_7, window_bounds = array<i64: 8, 128>}]} {
    %c0 = arith.constant 0 : index
    %c0_0 = arith.constant 0 : index
    %0 = vector.load %arg1[%c0, %c0_0] : memref<8x128xf32, #tpu.memory_space<vmem>>, vector<8x128xf32>
    %c0_1 = arith.constant 0 : index
    %c0_2 = arith.constant 0 : index
    %1 = vector.load %arg2[%c0_1, %c0_2] : memref<128x128xbf16, #tpu.memory_space<vmem>>, vector<128x128xbf16>
    %c0_3 = arith.constant 0 : index
    %c0_4 = arith.constant 0 : index
    %2 = vector.load %arg3[%c0_3, %c0_4] : memref<1x128xbf16, #tpu.memory_space<vmem>>, vector<1x128xbf16>
    %3 = arith.truncf %0 : vector<8x128xf32> to vector<8x128xbf16>
    %cst = arith.constant dense<0.000000e+00> : vector<8x128xf32>
    %4 = tpu.matmul %3, %1, %cst {dimension_numbers = #tpu.dot_dimension_numbers<[1], [0], [0], [1], [0, 0, 1, 1], [], []>} : vector<8x128xbf16>, vector<128x128xbf16>, vector<8x128xf32> -> vector<8x128xf32>
    %5 = arith.extf %2 : vector<1x128xbf16> to vector<1x128xf32>
    %6 = vector.broadcast %5 : vector<1x128xf32> to vector<8x128xf32>
    %7 = arith.addf %4, %6 : vector<8x128xf32>
    %cst_5 = arith.constant 0.000000e+00 : f32
    %8 = vector.broadcast %cst_5 : f32 to vector<8x128xf32>
    %9 = arith.maximumf %7, %8 : vector<8x128xf32>
    %c0_6 = arith.constant 0 : index
    %c0_7 = arith.constant 0 : index
    %10 = vector.load %arg4[%c0_6, %c0_7] : memref<128x128xbf16, #tpu.memory_space<vmem>>, vector<128x128xbf16>
    %c0_8 = arith.constant 0 : index
    %c0_9 = arith.constant 0 : index
    %11 = vector.load %arg5[%c0_8, %c0_9] : memref<1x128xbf16, #tpu.memory_space<vmem>>, vector<1x128xbf16>
    %12 = arith.truncf %9 : vector<8x128xf32> to vector<8x128xbf16>
    %cst_10 = arith.constant dense<0.000000e+00> : vector<8x128xf32>
    %13 = tpu.matmul %12, %10, %cst_10 {dimension_numbers = #tpu.dot_dimension_numbers<[1], [0], [0], [1], [0, 0, 1, 1], [], []>} : vector<8x128xbf16>, vector<128x128xbf16>, vector<8x128xf32> -> vector<8x128xf32>
    %14 = arith.extf %11 : vector<1x128xbf16> to vector<1x128xf32>
    %15 = vector.broadcast %14 : vector<1x128xf32> to vector<8x128xf32>
    %16 = arith.addf %13, %15 : vector<8x128xf32>
    %cst_11 = arith.constant 0.000000e+00 : f32
    %17 = vector.broadcast %cst_11 : f32 to vector<8x128xf32>
    %18 = arith.maximumf %16, %17 : vector<8x128xf32>
    %c0_12 = arith.constant 0 : index
    %c0_13 = arith.constant 0 : index
    %19 = vector.load %arg6[%c0_12, %c0_13] : memref<128x128xbf16, #tpu.memory_space<vmem>>, vector<128x128xbf16>
    %c0_14 = arith.constant 0 : index
    %c0_15 = arith.constant 0 : index
    %20 = vector.load %arg7[%c0_14, %c0_15] : memref<1x128xbf16, #tpu.memory_space<vmem>>, vector<1x128xbf16>
    %21 = arith.truncf %18 : vector<8x128xf32> to vector<8x128xbf16>
    %cst_16 = arith.constant dense<0.000000e+00> : vector<8x128xf32>
    %22 = tpu.matmul %21, %19, %cst_16 {dimension_numbers = #tpu.dot_dimension_numbers<[1], [0], [0], [1], [0, 0, 1, 1], [], []>} : vector<8x128xbf16>, vector<128x128xbf16>, vector<8x128xf32> -> vector<8x128xf32>
    %23 = arith.extf %20 : vector<1x128xbf16> to vector<1x128xf32>
    %24 = vector.broadcast %23 : vector<1x128xf32> to vector<8x128xf32>
    %25 = arith.addf %22, %24 : vector<8x128xf32>
    %c0_17 = arith.constant 0 : index
    %c0_18 = arith.constant 0 : index
    %26 = vector.load %arg8[%c0_17, %c0_18] : memref<8x128xf32, #tpu.memory_space<vmem>>, vector<8x128xf32>
    tpu.vector_store %arg8[%c0_17, %c0_18], %25 {strides = array<i32>} : memref<8x128xf32, #tpu.memory_space<vmem>>, vector<8x128xf32>,
    return
  }
  func.func @transform_0(%arg0: i32) -> (i32, i32) {
    %c0_i32 = arith.constant 0 : i32
    %c0_i32_0 = arith.constant 0 : i32
    return %arg0, %c0_i32 : i32, i32
  }
  func.func @transform_1(%arg0: i32) -> (i32, i32) {
    %c0_i32 = arith.constant 0 : i32
    %c0_i32_0 = arith.constant 0 : i32
    %c0_i32_1 = arith.constant 0 : i32
    return %c0_i32, %c0_i32_0 : i32, i32
  }
  func.func @transform_2(%arg0: i32) -> (i32, i32) {
    %c0_i32 = arith.constant 0 : i32
    %c0_i32_0 = arith.constant 0 : i32
    %c0_i32_1 = arith.constant 0 : i32
    return %c0_i32, %c0_i32_0 : i32, i32
  }
  func.func @transform_3(%arg0: i32) -> (i32, i32) {
    %c0_i32 = arith.constant 0 : i32
    %c0_i32_0 = arith.constant 0 : i32
    %c0_i32_1 = arith.constant 0 : i32
    return %c0_i32, %c0_i32_0 : i32, i32
  }
  func.func @transform_4(%arg0: i32) -> (i32, i32) {
    %c0_i32 = arith.constant 0 : i32
    %c0_i32_0 = arith.constant 0 : i32
    %c0_i32_1 = arith.constant 0 : i32
    return %c0_i32, %c0_i32_0 : i32, i32
  }
  func.func @transform_5(%arg0: i32) -> (i32, i32) {
    %c0_i32 = arith.constant 0 : i32
    %c0_i32_0 = arith.constant 0 : i32
    %c0_i32_1 = arith.constant 0 : i32
    return %c0_i32, %c0_i32_0 : i32, i32
  }
  func.func @transform_6(%arg0: i32) -> (i32, i32) {
    %c0_i32 = arith.constant 0 : i32
    %c0_i32_0 = arith.constant 0 : i32
    %c0_i32_1 = arith.constant 0 : i32
    return %c0_i32, %c0_i32_0 : i32, i32
  }
  func.func @transform_7(%arg0: i32) -> (i32, i32) {
    %c0_i32 = arith.constant 0 : i32
    %c0_i32_0 = arith.constant 0 : i32
    return %arg0, %c0_i32 : i32, i32
  }
}

</mosaic_0001>

<bundles_post_ra>
// kernel: _mlp_forward.1
= control target key start
LH: loop header
LB: loop body
LE: loop exit
PB: predicated region body
PF: predicated region fallthrough
CT: control target
= control target key end

     0   :  { %12 = vsyncpa [#allocation3], 0  ;;  %s718_s0 = inlined_call_operand.vmem [shape: f32[8,128], index: 0, kind: input, shape index: {}]   ;;  %s719_s1 = inlined_call_operand.hbm [shape: bf16[128,128], index: 1, kind: input, shape index: {}]   ;;  %s720_s2 = inlined_call_operand.vmem [shape: bf16[1,128], index: 2, kind: input, shape index: {}]   ;;  %s721_s3 = inlined_call_operand.hbm [shape: bf16[128,128], index: 3, kind: input, shape index: {}]   ;;  %s722_s4 = inlined_call_operand.vmem [shape: bf16[1,128], index: 4, kind: input, shape index: {}]   ;;  %s723_s5 = inlined_call_operand.hbm [shape: bf16[128,128], index: 5, kind: input, shape index: {}]   ;;  %s724_s6 = inlined_call_operand.vmem [shape: bf16[1,128], index: 6, kind: input, shape index: {}]   ;;  %s725_s7 = inlined_call_operand.vmem [shape: f32[8,128], index: 7, kind: output, shape index: {}]  }
   0x1   :  { %13 = vsyncpa [#allocation5], 0  ;;  %s617_s24 = smov [#allocation4]   ;;  %s618_s26 = smov [#allocation2]  }
   0x2   :  { %s35_s25 = sshll.u32 %s617_s24, 4  ;;  %s21_s27 = sshll.u32 %s618_s26, 4  ;;  %s36_s25 = int_to_ptr.vmem [resolvable:$true] %s35_s25  ;;  %s22_s27 = int_to_ptr.vmem [resolvable:$true] %s21_s27 }
   0x3   :  { %s561_s28 = scalar_lea.vmem %s36_s25, 1024  ;;  %p566_p1 = scmp.lt.s32.totalorder %s36_s25, %s36_s25 }
   0x4   :  { %p562_p0 = scmp.ne.s32.totalorder %s36_s25, %s561_s28  ;;  %p567_p2 = scmp.lt.s32.totalorder %s561_s28, %s561_s28 }
   0x6   :  { %p568_p3 = por %p567_p2, %p566_p1 }
   0x8   :  { %p569_p4 = pnand %p568_p3, %p562_p0 }
   0xa   :  { %572 = shalt.err (!%p569_p4)
}
   0xb   :  { %s619_s29 = smov 64   ;;  %s620_s30 = smov 4  }
   0xc   :  { %41 = dma.hbm_to_vmem [thread:$0]  %s721_s3, 1024, %s36_s25, [#allocation5], %s619_s29, %s619_s29, %s620_s30  }
   0xd   :  { %s581_s10 = scalar_lea.vmem %s22_s27, 1024  ;;  %p586_p6 = scmp.lt.s32.totalorder %s22_s27, %s22_s27 }
   0xe   :  { %p582_p5 = scmp.ne.s32.totalorder %s22_s27, %s581_s10  ;;  %p587_p7 = scmp.lt.s32.totalorder %s581_s10, %s581_s10 }
  0x10   :  { %p588_p8 = por %p587_p7, %p586_p6 }
  0x12   :  { %p589_p9 = pnand %p588_p8, %p582_p5 }
  0x14   :  { %592 = shalt.err (!%p589_p9)
}
  0x15   :  { %27 = dma.hbm_to_vmem [thread:$0]  %s719_s1, 1024, %s22_s27, [#allocation3], %s619_s29, %s619_s29, %s620_s30  }
  0x16   :  { %s621_s13 = smov [#allocation6]  }
  0x17   :  { %s49_s14 = sshll.u32 %s621_s13, 4  ;;  %s50_s14 = int_to_ptr.vmem [resolvable:$true] %s49_s14 }
  0x18   :  { %s601_s15 = scalar_lea.vmem %s50_s14, 1024  ;;  %p606_p11 = scmp.lt.s32.totalorder %s50_s14, %s50_s14 }
  0x19   :  { %p602_p10 = scmp.ne.s32.totalorder %s50_s14, %s601_s15  ;;  %p607_p12 = scmp.lt.s32.totalorder %s601_s15, %s601_s15 }
  0x1b   :  { %p608_p13 = por %p607_p12, %p606_p11 }
  0x1d   :  { %p609_p0 = pnand %p608_p13, %p602_p10 }
  0x1f   :  { %612 = shalt.err (!%p609_p0)
}
  0x20   :  { %55 = dma.hbm_to_vmem [thread:$0]  %s723_s5, 1024, %s50_s14, [#allocation5], %s619_s29, %s619_s29, %s620_s30  }
  0x21   :  { %613 = dma.done.wait [#allocation3], 1024  }
  0x22   :  { %614 = vsyncadd [#allocation3], 4294966272 }
  0x23   :  { %615 = dma.done.wait [#allocation5], 2048  }
  0x24   :  { %616 = vsyncadd [#allocation5], 4294965248  ;;  %v622_v0 = vmov 0.0   ;;  %vm623_vm0 = vmmov 0   ;;  %v529_v1 = vld [vmem:[#allocation2 + $0x38] sm:$0xff]   ;;  %v530_v2 = vld [vmem:[#allocation2 + $0x30] sm:$0xff]   ;;  %v88_v25 = vlaneseq }
  0x25   :  { %462 = vmatprep.subr.bf16.mxu0 %v622_v0  ;;  %478 = vmatprep.mubr.msk.bf16.mxu0 %vm623_vm0, %v622_v0  ;;  %v531_v3 = vld [vmem:[#allocation2 + $0x28] sm:$0xff]   ;;  %v537_v4 = vld [vmem:[#allocation4 + $0x38] sm:$0xff]   ;;  %v532_v5 = vld [vmem:[#allocation2 + $0x20] sm:$0xff]  }
  0x26   :  { %482 = vmatprep.subr.bf16.mxu1 %v622_v0  ;;  %498 = vmatprep.mubr.msk.bf16.mxu1 %vm623_vm0, %v622_v0  ;;  %v538_v6 = vld [vmem:[#allocation4 + $0x30] sm:$0xff]   ;;  %v533_v7 = vld [vmem:[#allocation2 + $0x18] sm:$0xff]   ;;  %v539_v8 = vld [vmem:[#allocation4 + $0x28] sm:$0xff]   ;;  %v89_v26 = vshrl.u32 %v88_v25, 7 }
  0x27   :  { %463 = vmatpush3.bf16.msra.mxu0 %v529_v1  ;;  %483 = vmatpush3.bf16.msra.mxu1 %v537_v4  ;;  %v534_v9 = vld [vmem:[#allocation2 + $0x10] sm:$0xff]   ;;  %v540_v10 = vld [vmem:[#allocation4 + $0x20] sm:$0xff]   ;;  %v535_v11 = vld [vmem:[#allocation2 + $0x8] sm:$0xff]  }
  0x28   :  { %464 = vmatprep.subr.bf16.mxu0 %v622_v0  ;;  %484 = vmatprep.subr.bf16.mxu1 %v622_v0  ;;  %v541_v12 = vld [vmem:[#allocation4 + $0x18] sm:$0xff]   ;;  %v536_v13 = vld [vmem:[#allocation2] sm:$0xff]   ;;  %v542_v15 = vld [vmem:[#allocation4 + $0x10] sm:$0xff]   ;;  %v90_v29 = vsub.s32 0, %v89_v26 }
  0x29   :  { %v68_v14 = vld [vmem:[%s718_s0] sm:$0xff]  ;;  %v543_v17 = vld [vmem:[#allocation4 + $0x8] sm:$0xff]   ;;  %v545_v19 = vld [vmem:[#allocation6 + $0x38] sm:$0xff]  }
  0x2a   :  { %v86_v16 = vpack.c.bf16 %v68_v14, %v68_v14  ;;  %v544_v18 = vld [vmem:[#allocation4] sm:$0xff]   ;;  %v546_v20 = vld [vmem:[#allocation6 + $0x30] sm:$0xff]   ;;  %v547_v21 = vld [vmem:[#allocation6 + $0x28] sm:$0xff]  }
  0x2b   :  { %465 = vmatpush3.bf16.msra.mxu0 %v530_v2  ;;  %485 = vmatpush3.bf16.msra.mxu1 %v538_v6  ;;  %v548_v22 = vld [vmem:[#allocation6 + $0x20] sm:$0xff]   ;;  %v549_v23 = vld [vmem:[#allocation6 + $0x18] sm:$0xff]   ;;  %v550_v24 = vld [vmem:[#allocation6 + $0x10] sm:$0xff]  }
  0x2c   :  { %466 = vmatprep.subr.bf16.mxu0 %v622_v0  ;;  %486 = vmatprep.subr.bf16.mxu1 %v622_v0  ;;  %v85_v27 = vld [vmem:[%s720_s2] sm:$0x1]  ;;  %v551_v38 = vld [vmem:[#allocation6 + $0x8] sm:$0xff]  }
  0x2d   :  { %v87_v28 = vunpack.c.l.bf16 %v85_v27  ;;  %v552_v39 = vld [vmem:[#allocation6] sm:$0xff]  }
  0x2e   :  { %v197_v40 = vld [vmem:[%s722_s4] sm:$0x1] }
  0x2f   :  { %467 = vmatpush3.bf16.msra.mxu0 %v531_v3  ;;  %487 = vmatpush3.bf16.msra.mxu1 %v539_v8  ;;  %v91_v30 = vrot.slane %v87_v28, %v90_v29  ;;  %v199_v41 = vunpack.c.l.bf16 %v197_v40  ;;  %v309_v50 = vld [vmem:[%s724_s6] sm:$0x1] }
  0x30   :  { %468 = vmatprep.subr.bf16.mxu0 %v622_v0  ;;  %488 = vmatprep.subr.bf16.mxu1 %v622_v0  ;;  %v311_v51 = vunpack.c.l.bf16 %v309_v50 }
  0x31   :  { %v203_v42 = vrot.slane %v199_v41, %v90_v29 }
  0x32   :  { %v315_v52 = vrot.slane %v311_v51, %v90_v29 }
  0x33   :  { %469 = vmatpush3.bf16.msra.mxu0 %v532_v5  ;;  %489 = vmatpush3.bf16.msra.mxu1 %v540_v10 }
  0x34   :  { %470 = vmatprep.subr.bf16.mxu0 %v622_v0  ;;  %490 = vmatprep.subr.bf16.mxu1 %v622_v0 }
  0x37   :  { %471 = vmatpush3.bf16.msra.mxu0 %v533_v7  ;;  %491 = vmatpush3.bf16.msra.mxu1 %v541_v12 }
  0x38   :  { %472 = vmatprep.subr.bf16.mxu0 %v622_v0  ;;  %492 = vmatprep.subr.bf16.mxu1 %v622_v0 }
  0x3b   :  { %473 = vmatpush3.bf16.msra.mxu0 %v534_v9  ;;  %493 = vmatpush3.bf16.msra.mxu1 %v542_v15 }
  0x3c   :  { %474 = vmatprep.subr.bf16.mxu0 %v622_v0  ;;  %494 = vmatprep.subr.bf16.mxu1 %v622_v0 }
  0x3f   :  { %475 = vmatpush3.bf16.msra.mxu0 %v535_v11  ;;  %495 = vmatpush3.bf16.msra.mxu1 %v543_v17 }
  0x40   :  { %476 = vmatprep.subr.bf16.mxu0 %v622_v0  ;;  %496 = vmatprep.subr.bf16.mxu1 %v622_v0 }
  0x43   :  { %477 = vmatpush3.bf16.msra.mxu0 %v536_v13  ;;  %497 = vmatpush3.bf16.msra.mxu1 %v544_v18 }
  0x44   :  { %502 = vmatprep.subr.bf16.mxu0 %v622_v0 }
  0x46   :  { %479 = vmatmul.mubr.bf16.vlgmr.msra.gmra.mxu0 %v86_v16 }
  0x47   :  { %518 = vmatprep.mubr.msk.bf16.mxu0 %vm623_vm0, %v622_v0  ;;  %503 = vmatpush3.bf16.msra.mxu0 %v545_v19 }
  0x48   :  { %504 = vmatprep.subr.bf16.mxu0 %v622_v0 }
  0x4b   :  { %505 = vmatpush3.bf16.msra.mxu0 %v546_v20 }
  0x4c   :  { %506 = vmatprep.subr.bf16.mxu0 %v622_v0 }
  0x4f   :  { %507 = vmatpush3.bf16.msra.mxu0 %v547_v21 }
  0x50   :  { %508 = vmatprep.subr.bf16.mxu0 %v622_v0 }
  0x53   :  { %509 = vmatpush3.bf16.msra.mxu0 %v548_v22 }
  0x54   :  { %510 = vmatprep.subr.bf16.mxu0 %v622_v0 }
  0x57   :  { %511 = vmatpush3.bf16.msra.mxu0 %v549_v23 }
  0x58   :  { %512 = vmatprep.subr.bf16.mxu0 %v622_v0 }
  0x5b   :  { %513 = vmatpush3.bf16.msra.mxu0 %v550_v24 }
  0x5c   :  { %514 = vmatprep.subr.bf16.mxu0 %v622_v0 }
  0x5f   :  { %515 = vmatpush3.bf16.msra.mxu0 %v551_v38 }
  0x60   :  { %516 = vmatprep.subr.bf16.mxu0 %v622_v0 }
  0x63   :  { %517 = vmatpush3.bf16.msra.mxu0 %v552_v39 }
 0x106   :  { %v174_v31 = vpop.f32.mrf.mxu0 }
 0x107   :  { %v175_v32 = vadd.f32 %v174_v31, %v91_v30 }
 0x108   :  { %v480_v33 = vpop.f32.mrf.mxu0 }
 0x109   :  { %v180_v34 = vmax.f32 %v175_v32, 0.0 }
 0x10a   :  { %v177_v35 = vpop.f32.mrf.mxu0 }
 0x10b   :  { %v198_v36 = vpack.c.bf16 %v180_v34, %v180_v34 }
 0x10c   :  { %v481_v37 = vpop.f32.mrf.mxu0 }
 0x10d   :  { %499 = vmatmul.mubr.bf16.vlgmr.msra.gmra.mxu1 %v198_v36 }
 0x1cd   :  { %v286_v43 = vpop.f32.mrf.mxu1 }
 0x1ce   :  { %v287_v44 = vadd.f32 %v286_v43, %v203_v42 }
 0x1cf   :  { %v500_v45 = vpop.f32.mrf.mxu1 }
 0x1d0   :  { %v292_v46 = vmax.f32 %v287_v44, 0.0 }
 0x1d1   :  { %v289_v47 = vpop.f32.mrf.mxu1 }
 0x1d2   :  { %v310_v48 = vpack.c.bf16 %v292_v46, %v292_v46 }
 0x1d3   :  { %v501_v49 = vpop.f32.mrf.mxu1 }
 0x1d4   :  { %519 = vmatmul.mubr.bf16.vlgmr.msra.gmra.mxu0 %v310_v48 }
 0x294   :  { %v398_v53 = vpop.f32.mrf.mxu0 }
 0x295   :  { %v399_v54 = vadd.f32 %v398_v53, %v315_v52 }
 0x296   :  { %v520_v55 = vpop.f32.mrf.mxu0 }
 0x297   :  { %404 = vst [vmem:[%s725_s7] sm:$0xff] %v399_v54 }
 0x298   :  { %v401_v56 = vpop.f32.mrf.mxu0 }
 0x29a   :  { %v521_v57 = vpop.f32.mrf.mxu0 }
 0x29b   :  { %409 = vsyncpa [#allocation3], 1 }
 0x29c   :  { %410 = vsyncpa [#allocation5], 1 }

// kernel: _mlp_forward.1
= control target key start
LH: loop header
LB: loop body
LE: loop exit
PB: predicated region body
PF: predicated region fallthrough
CT: control target
= control target key end

     0   :  { %12 = vsyncpa [#allocation3], 0  ;;  %s718_s0 = inlined_call_operand.vmem [shape: f32[8,128], index: 0, kind: input, shape index: {}]   ;;  %s719_s1 = inlined_call_operand.hbm [shape: bf16[128,128], index: 1, kind: input, shape index: {}]   ;;  %s720_s2 = inlined_call_operand.vmem [shape: bf16[1,128], index: 2, kind: input, shape index: {}]   ;;  %s721_s3 = inlined_call_operand.hbm [shape: bf16[128,128], index: 3, kind: input, shape index: {}]   ;;  %s722_s4 = inlined_call_operand.vmem [shape: bf16[1,128], index: 4, kind: input, shape index: {}]   ;;  %s723_s5 = inlined_call_operand.hbm [shape: bf16[128,128], index: 5, kind: input, shape index: {}]   ;;  %s724_s6 = inlined_call_operand.vmem [shape: bf16[1,128], index: 6, kind: input, shape index: {}]   ;;  %s725_s7 = inlined_call_operand.vmem [shape: f32[8,128], index: 7, kind: output, shape index: {}]  }
   0x1   :  { %13 = vsyncpa [#allocation5], 0  ;;  %s617_s24 = smov [#allocation4]   ;;  %s618_s26 = smov [#allocation2]  }
   0x2   :  { %s35_s25 = sshll.u32 %s617_s24, 4  ;;  %s21_s27 = sshll.u32 %s618_s26, 4  ;;  %s36_s25 = int_to_ptr.vmem [resolvable:$true] %s35_s25  ;;  %s22_s27 = int_to_ptr.vmem [resolvable:$true] %s21_s27 }
   0x3   :  { %s561_s28 = scalar_lea.vmem %s36_s25, 1024  ;;  %p566_p1 = scmp.lt.s32.totalorder %s36_s25, %s36_s25 }
   0x4   :  { %p562_p0 = scmp.ne.s32.totalorder %s36_s25, %s561_s28  ;;  %p567_p2 = scmp.lt.s32.totalorder %s561_s28, %s561_s28 }
   0x6   :  { %p568_p3 = por %p567_p2, %p566_p1 }
   0x8   :  { %p569_p4 = pnand %p568_p3, %p562_p0 }
   0xa   :  { %572 = shalt.err (!%p569_p4)
}
   0xb   :  { %s619_s29 = smov 64   ;;  %s620_s30 = smov 4  }
   0xc   :  { %41 = dma.hbm_to_vmem [thread:$0]  %s721_s3, 1024, %s36_s25, [#allocation5], %s619_s29, %s619_s29, %s620_s30  }
   0xd   :  { %s581_s10 = scalar_lea.vmem %s22_s27, 1024  ;;  %p586_p6 = scmp.lt.s32.totalorder %s22_s27, %s22_s27 }
   0xe   :  { %p582_p5 = scmp.ne.s32.totalorder %s22_s27, %s581_s10  ;;  %p587_p7 = scmp.lt.s32.totalorder %s581_s10, %s581_s10 }
  0x10   :  { %p588_p8 = por %p587_p7, %p586_p6 }
  0x12   :  { %p589_p9 = pnand %p588_p8, %p582_p5 }
  0x14   :  { %592 = shalt.err (!%p589_p9)
}
  0x15   :  { %27 = dma.hbm_to_vmem [thread:$0]  %s719_s1, 1024, %s22_s27, [#allocation3], %s619_s29, %s619_s29, %s620_s30  }
  0x16   :  { %s621_s13 = smov [#allocation6]  }
  0x17   :  { %s49_s14 = sshll.u32 %s621_s13, 4  ;;  %s50_s14 = int_to_ptr.vmem [resolvable:$true] %s49_s14 }
  0x18   :  { %s601_s15 = scalar_lea.vmem %s50_s14, 1024  ;;  %p606_p11 = scmp.lt.s32.totalorder %s50_s14, %s50_s14 }
  0x19   :  { %p602_p10 = scmp.ne.s32.totalorder %s50_s14, %s601_s15  ;;  %p607_p12 = scmp.lt.s32.totalorder %s601_s15, %s601_s15 }
  0x1b   :  { %p608_p13 = por %p607_p12, %p606_p11 }
  0x1d   :  { %p609_p0 = pnand %p608_p13, %p602_p10 }
  0x1f   :  { %612 = shalt.err (!%p609_p0)
}
  0x20   :  { %55 = dma.hbm_to_vmem [thread:$0]  %s723_s5, 1024, %s50_s14, [#allocation5], %s619_s29, %s619_s29, %s620_s30  }
  0x21   :  { %613 = dma.done.wait [#allocation3], 1024  }
  0x22   :  { %614 = vsyncadd [#allocation3], 4294966272 }
  0x23   :  { %615 = dma.done.wait [#allocation5], 2048  }
  0x24   :  { %616 = vsyncadd [#allocation5], 4294965248  ;;  %v622_v0 = vmov 0.0   ;;  %vm623_vm0 = vmmov 0   ;;  %v529_v1 = vld [vmem:[#allocation2 + $0x38] sm:$0xff]   ;;  %v530_v2 = vld [vmem:[#allocation2 + $0x30] sm:$0xff]   ;;  %v88_v25 = vlaneseq }
  0x25   :  { %462 = vmatprep.subr.bf16.mxu0 %v622_v0  ;;  %478 = vmatprep.mubr.msk.bf16.mxu0 %vm623_vm0, %v622_v0  ;;  %v531_v3 = vld [vmem:[#allocation2 + $0x28] sm:$0xff]   ;;  %v537_v4 = vld [vmem:[#allocation4 + $0x38] sm:$0xff]   ;;  %v532_v5 = vld [vmem:[#allocation2 + $0x20] sm:$0xff]  }
  0x26   :  { %482 = vmatprep.subr.bf16.mxu1 %v622_v0  ;;  %498 = vmatprep.mubr.msk.bf16.mxu1 %vm623_vm0, %v622_v0  ;;  %v538_v6 = vld [vmem:[#allocation4 + $0x30] sm:$0xff]   ;;  %v533_v7 = vld [vmem:[#allocation2 + $0x18] sm:$0xff]   ;;  %v539_v8 = vld [vmem:[#allocation4 + $0x28] sm:$0xff]   ;;  %v89_v26 = vshrl.u32 %v88_v25, 7 }
  0x27   :  { %463 = vmatpush3.bf16.msra.mxu0 %v529_v1  ;;  %483 = vmatpush3.bf16.msra.mxu1 %v537_v4  ;;  %v534_v9 = vld [vmem:[#allocation2 + $0x10] sm:$0xff]   ;;  %v540_v10 = vld [vmem:[#allocation4 + $0x20] sm:$0xff]   ;;  %v535_v11 = vld [vmem:[#allocation2 + $0x8] sm:$0xff]  }
  0x28   :  { %464 = vmatprep.subr.bf16.mxu0 %v622_v0  ;;  %484 = vmatprep.subr.bf16.mxu1 %v622_v0  ;;  %v541_v12 = vld [vmem:[#allocation4 + $0x18] sm:$0xff]   ;;  %v536_v13 = vld [vmem:[#allocation2] sm:$0xff]   ;;  %v542_v15 = vld [vmem:[#allocation4 + $0x10] sm:$0xff]   ;;  %v90_v29 = vsub.s32 0, %v89_v26 }
  0x29   :  { %v68_v14 = vld [vmem:[%s718_s0] sm:$0xff]  ;;  %v543_v17 = vld [vmem:[#allocation4 + $0x8] sm:$0xff]   ;;  %v545_v19 = vld [vmem:[#allocation6 + $0x38] sm:$0xff]  }
  0x2a   :  { %v86_v16 = vpack.c.bf16 %v68_v14, %v68_v14  ;;  %v544_v18 = vld [vmem:[#allocation4] sm:$0xff]   ;;  %v546_v20 = vld [vmem:[#allocation6 + $0x30] sm:$0xff]   ;;  %v547_v21 = vld [vmem:[#allocation6 + $0x28] sm:$0xff]  }
  0x2b   :  { %465 = vmatpush3.bf16.msra.mxu0 %v530_v2  ;;  %485 = vmatpush3.bf16.msra.mxu1 %v538_v6  ;;  %v548_v22 = vld [vmem:[#allocation6 + $0x20] sm:$0xff]   ;;  %v549_v23 = vld [vmem:[#allocation6 + $0x18] sm:$0xff]   ;;  %v550_v24 = vld [vmem:[#allocation6 + $0x10] sm:$0xff]  }
  0x2c   :  { %466 = vmatprep.subr.bf16.mxu0 %v622_v0  ;;  %486 = vmatprep.subr.bf16.mxu1 %v622_v0  ;;  %v85_v27 = vld [vmem:[%s720_s2] sm:$0x1]  ;;  %v551_v38 = vld [vmem:[#allocation6 + $0x8] sm:$0xff]  }
  0x2d   :  { %v87_v28 = vunpack.c.l.bf16 %v85_v27  ;;  %v552_v39 = vld [vmem:[#allocation6] sm:$0xff]  }
  0x2e   :  { %v197_v40 = vld [vmem:[%s722_s4] sm:$0x1] }
  0x2f   :  { %467 = vmatpush3.bf16.msra.mxu0 %v531_v3  ;;  %487 = vmatpush3.bf16.msra.mxu1 %v539_v8  ;;  %v91_v30 = vrot.slane %v87_v28, %v90_v29  ;;  %v199_v41 = vunpack.c.l.bf16 %v197_v40  ;;  %v309_v50 = vld [vmem:[%s724_s6] sm:$0x1] }
  0x30   :  { %468 = vmatprep.subr.bf16.mxu0 %v622_v0  ;;  %488 = vmatprep.subr.bf16.mxu1 %v622_v0  ;;  %v311_v51 = vunpack.c.l.bf16 %v309_v50 }
  0x31   :  { %v203_v42 = vrot.slane %v199_v41, %v90_v29 }
  0x32   :  { %v315_v52 = vrot.slane %v311_v51, %v90_v29 }
  0x33   :  { %469 = vmatpush3.bf16.msra.mxu0 %v532_v5  ;;  %489 = vmatpush3.bf16.msra.mxu1 %v540_v10 }
  0x34   :  { %470 = vmatprep.subr.bf16.mxu0 %v622_v0  ;;  %490 = vmatprep.subr.bf16.mxu1 %v622_v0 }
  0x37   :  { %471 = vmatpush3.bf16.msra.mxu0 %v533_v7  ;;  %491 = vmatpush3.bf16.msra.mxu1 %v541_v12 }
  0x38   :  { %472 = vmatprep.subr.bf16.mxu0 %v622_v0  ;;  %492 = vmatprep.subr.bf16.mxu1 %v622_v0 }
  0x3b   :  { %473 = vmatpush3.bf16.msra.mxu0 %v534_v9  ;;  %493 = vmatpush3.bf16.msra.mxu1 %v542_v15 }
  0x3c   :  { %474 = vmatprep.subr.bf16.mxu0 %v622_v0  ;;  %494 = vmatprep.subr.bf16.mxu1 %v622_v0 }
  0x3f   :  { %475 = vmatpush3.bf16.msra.mxu0 %v535_v11  ;;  %495 = vmatpush3.bf16.msra.mxu1 %v543_v17 }
  0x40   :  { %476 = vmatprep.subr.bf16.mxu0 %v622_v0  ;;  %496 = vmatprep.subr.bf16.mxu1 %v622_v0 }
  0x43   :  { %477 = vmatpush3.bf16.msra.mxu0 %v536_v13  ;;  %497 = vmatpush3.bf16.msra.mxu1 %v544_v18 }
  0x44   :  { %502 = vmatprep.subr.bf16.mxu0 %v622_v0 }
  0x46   :  { %479 = vmatmul.mubr.bf16.vlgmr.msra.gmra.mxu0 %v86_v16 }
  0x47   :  { %518 = vmatprep.mubr.msk.bf16.mxu0 %vm623_vm0, %v622_v0  ;;  %503 = vmatpush3.bf16.msra.mxu0 %v545_v19 }
  0x48   :  { %504 = vmatprep.subr.bf16.mxu0 %v622_v0 }
  0x4b   :  { %505 = vmatpush3.bf16.msra.mxu0 %v546_v20 }
  0x4c   :  { %506 = vmatprep.subr.bf16.mxu0 %v622_v0 }
  0x4f   :  { %507 = vmatpush3.bf16.msra.mxu0 %v547_v21 }
  0x50   :  { %508 = vmatprep.subr.bf16.mxu0 %v622_v0 }
  0x53   :  { %509 = vmatpush3.bf16.msra.mxu0 %v548_v22 }
  0x54   :  { %510 = vmatprep.subr.bf16.mxu0 %v622_v0 }
  0x57   :  { %511 = vmatpush3.bf16.msra.mxu0 %v549_v23 }
  0x58   :  { %512 = vmatprep.subr.bf16.mxu0 %v622_v0 }
  0x5b   :  { %513 = vmatpush3.bf16.msra.mxu0 %v550_v24 }
  0x5c   :  { %514 = vmatprep.subr.bf16.mxu0 %v622_v0 }
  0x5f   :  { %515 = vmatpush3.bf16.msra.mxu0 %v551_v38 }
  0x60   :  { %516 = vmatprep.subr.bf16.mxu0 %v622_v0 }
  0x63   :  { %517 = vmatpush3.bf16.msra.mxu0 %v552_v39 }
 0x106   :  { %v174_v31 = vpop.f32.mrf.mxu0 }
 0x107   :  { %v175_v32 = vadd.f32 %v174_v31, %v91_v30 }
 0x108   :  { %v480_v33 = vpop.f32.mrf.mxu0 }
 0x109   :  { %v180_v34 = vmax.f32 %v175_v32, 0.0 }
 0x10a   :  { %v177_v35 = vpop.f32.mrf.mxu0 }
 0x10b   :  { %v198_v36 = vpack.c.bf16 %v180_v34, %v180_v34 }
 0x10c   :  { %v481_v37 = vpop.f32.mrf.mxu0 }
 0x10d   :  { %499 = vmatmul.mubr.bf16.vlgmr.msra.gmra.mxu1 %v198_v36 }
 0x1cd   :  { %v286_v43 = vpop.f32.mrf.mxu1 }
 0x1ce   :  { %v287_v44 = vadd.f32 %v286_v43, %v203_v42 }
 0x1cf   :  { %v500_v45 = vpop.f32.mrf.mxu1 }
 0x1d0   :  { %v292_v46 = vmax.f32 %v287_v44, 0.0 }
 0x1d1   :  { %v289_v47 = vpop.f32.mrf.mxu1 }
 0x1d2   :  { %v310_v48 = vpack.c.bf16 %v292_v46, %v292_v46 }
 0x1d3   :  { %v501_v49 = vpop.f32.mrf.mxu1 }
 0x1d4   :  { %519 = vmatmul.mubr.bf16.vlgmr.msra.gmra.mxu0 %v310_v48 }
 0x294   :  { %v398_v53 = vpop.f32.mrf.mxu0 }
 0x295   :  { %v399_v54 = vadd.f32 %v398_v53, %v315_v52 }
 0x296   :  { %v520_v55 = vpop.f32.mrf.mxu0 }
 0x297   :  { %404 = vst [vmem:[%s725_s7] sm:$0xff] %v399_v54 }
 0x298   :  { %v401_v56 = vpop.f32.mrf.mxu0 }
 0x29a   :  { %v521_v57 = vpop.f32.mrf.mxu0 }
 0x29b   :  { %409 = vsyncpa [#allocation3], 1 }
 0x29c   :  { %410 = vsyncpa [#allocation5], 1 }

</bundles_post_ra>
